<compile_context>
chip_gen: v7x
topology: tpu7x:2x2x1
jax: 0.10.0
libtpu: 0.0.40
codegen_flags: <defaults>
</compile_context>

<pallas_src>
import math
import functools

import jax
import jax.numpy as jnp
from jax import lax
from jax.experimental import pallas as pl
from jax.experimental.pallas import tpu as pltpu


def _layernorm(x, gamma, beta, eps=1e-5):
    mu = jnp.mean(x, axis=-1, keepdims=True)
    var = jnp.mean((x - mu) ** 2, axis=-1, keepdims=True)
    return (x - mu) * lax.rsqrt(var + eps) * gamma + beta


def _gelu_exact(x):
    # F.gelu default: exact erf-based GELU
    return 0.5 * x * (1.0 + lax.erf(x * (1.0 / math.sqrt(2.0))))


def block_kernel(n_head,
                 x_ref, bias_ref,
                 ln1g_ref, ln1b_ref,
                 wqkv_ref, bqkv_ref,
                 wph_ref, bp_ref,
                 ln2g_ref, ln2b_ref,
                 w1_ref, b1_ref, w2_ref, b2_ref,
                 out_ref):
    x = x_ref[...]                               # (N, C), N = B*T
    N, C = x.shape
    hd = C // n_head

    # ---- attention branch ----
    h = _layernorm(x, ln1g_ref[...], ln1b_ref[...])                     # (N, C)
    # 1/sqrt(hd) is already folded into the Q columns of wqkv / bqkv (wrapper).
    qkv = jnp.dot(h, wqkv_ref[...], preferred_element_type=jnp.float32) \
          + bqkv_ref[...]                                               # (N, 3C)
    q = qkv[:, 0:C]
    k = qkv[:, C:2 * C]
    v = qkv[:, 2 * C:3 * C]

    bias = bias_ref[...]             # (N, N) additive bias: 0 = attend, -1e30 = masked
                                     # (block-diagonal => also blocks cross-batch attention)

    # Residual (x) + output-projection bias folded into the accumulator init.
    acc = x + bp_ref[...]                                               # (N, C) f32
    for hh in range(n_head):                     # static unrolled loop over heads
        lo = hh * hd
        qh = q[:, lo:lo + hd]                    # (N, hd)
        kh = k[:, lo:lo + hd]
        vh = v[:, lo:lo + hd]
        # scores over ALL rows; cross-batch / causal-masked entries get -1e30 bias
        s = lax.dot_general(qh, kh, (((1,), (1,)), ((), ())),
                            preferred_element_type=jnp.float32) + bias  # (N, N)
        s = s - jnp.max(s, axis=-1, keepdims=True)
        p = jnp.exp(s)
        p = p * pl.reciprocal(jnp.sum(p, axis=-1, keepdims=True), approx=True)
        yh = jnp.dot(p, vh, preferred_element_type=jnp.float32)         # (N, hd)
        # project this head directly into the full-width output (no lane concat)
        acc = acc + jnp.dot(yh, wph_ref[hh], preferred_element_type=jnp.float32)

    x1 = acc                                                            # residual 1 done

    # ---- MLP branch ----
    h2 = _layernorm(x1, ln2g_ref[...], ln2b_ref[...])
    a = jnp.dot(h2, w1_ref[...], preferred_element_type=jnp.float32) + b1_ref[...]
    a = _gelu_exact(a)
    m = jnp.dot(a, w2_ref[...], preferred_element_type=jnp.float32) + b2_ref[...]

    out_ref[...] = x1 + m                                               # residual 2


def block_forward(x, mask, params, n_head):
    """x: (B, T, C) f32, mask: (T, T) f32 (1=attend), params: pre-transposed weights."""
    B, T, C = x.shape
    N = B * T
    H = params["w1"].shape[1]
    hd = C // n_head
    scale = 1.0 / math.sqrt(hd)

    # Fuse QKV weights / biases: one (C, 3C) matmul in the kernel.
    # The attention scale is folded into the Q columns (one-time weight prep).
    wqkv = jnp.concatenate(
        [params["wq"] * scale, params["wk"], params["wv"]], axis=1)
    bqkv = jnp.concatenate(
        [params["bq"] * scale, params["bk"], params["bv"]], axis=1)
    # Split the output projection per head: (C, C) -> (n_head, hd, C).
    wph = params["wp"].reshape(n_head, hd, C)

    # Additive attention bias, hoisted out of the kernel:
    # block-diagonal over batches, -1e30 where masked / cross-batch.
    blk = jnp.where(mask == 0.0, jnp.float32(-1e30), jnp.float32(0.0))   # (T, T)
    bias = jnp.full((N, N), -1e30, dtype=jnp.float32)
    for b in range(B):
        bias = bias.at[b * T:(b + 1) * T, b * T:(b + 1) * T].set(blk)

    x_flat = x.reshape(N, C)

    def full(shape):
        return pl.BlockSpec(shape, lambda i: (0,) * len(shape))

    in_specs = [
        full((N, C)),                 # x (flattened rows)
        full((N, N)),                 # additive attention bias
        full((1, C)), full((1, C)),   # ln1 gamma/beta
        full((C, 3 * C)), full((1, 3 * C)),   # fused Wqkv, bqkv (scale folded into Q)
        full((n_head, hd, C)), full((1, C)),  # per-head Wproj, bproj
        full((1, C)), full((1, C)),   # ln2 gamma/beta
        full((C, H)), full((1, H)),   # W1, b1
        full((H, C)), full((1, C)),   # W2, b2
    ]

    kernel = functools.partial(block_kernel, n_head)

    out = pl.pallas_call(
        kernel,
        out_shape=jax.ShapeDtypeStruct((N, C), jnp.float32),
        grid_spec=pltpu.PrefetchScalarGridSpec(
            num_scalar_prefetch=0,
            grid=(1,),                               # whole problem in one step
            in_specs=in_specs,
            out_specs=full((N, C)),
        ),
        compiler_params=pltpu.CompilerParams(dimension_semantics=("parallel",)),
    )(x_flat, bias,
      params["ln1_g"], params["ln1_b"],
      wqkv, bqkv, wph, params["bp"],
      params["ln2_g"], params["ln2_b"],
      params["w1"], params["b1"], params["w2"], params["b2"])

    return out.reshape(B, T, C)


def block_reference(x, mask, params, n_head):
    """Pure-JAX reference matching the PyTorch forward (eval mode)."""
    B, T, C = x.shape
    hd = C // n_head

    h = _layernorm(x, params["ln1_g"], params["ln1_b"])
    q = h @ params["wq"] + params["bq"]
    k = h @ params["wk"] + params["bk"]
    v = h @ params["wv"] + params["bv"]
    q = q.reshape(B, T, n_head, hd).transpose(0, 2, 1, 3)
    k = k.reshape(B, T, n_head, hd).transpose(0, 2, 1, 3)
    v = v.reshape(B, T, n_head, hd).transpose(0, 2, 1, 3)
    att = (q @ k.transpose(0, 1, 3, 2)) / math.sqrt(hd)
    att = jnp.where(mask[None, None] == 0.0, -1e30, att)
    att = jax.nn.softmax(att, axis=-1)
    y = (att @ v).transpose(0, 2, 1, 3).reshape(B, T, C)
    y = y @ params["wp"] + params["bp"]
    x1 = x + y

    h2 = _layernorm(x1, params["ln2_g"], params["ln2_b"])
    a = _gelu_exact(h2 @ params["w1"] + params["b1"])
    return x1 + a @ params["w2"] + params["b2"]


if __name__ == "__main__":
    # config: n_embd=32, n_head=4, block_size=6, len_key_states=2, model_type='naive'
    B, T, C = 2, 8, 32
    n_head = 4
    H = 4 * C
    len_key_states = 2
    block_size = 6          # block_size + len_key_states = 8 >= T

    key = jax.random.PRNGKey(0)
    keys = jax.random.split(key, 8)

    def w(k, shape):
        return (0.02 * jax.random.normal(k, shape)).astype(jnp.float32)

    # nn.Linear weights stored as (out, in) in torch; here pre-transposed to (in, out).
    params = {
        "ln1_g": jnp.ones((1, C), jnp.float32),
        "ln1_b": jnp.zeros((1, C), jnp.float32),
        "wq": w(keys[0], (C, C)), "bq": jnp.zeros((1, C), jnp.float32),
        "wk": w(keys[1], (C, C)), "bk": jnp.zeros((1, C), jnp.float32),
        "wv": w(keys[2], (C, C)), "bv": jnp.zeros((1, C), jnp.float32),
        "wp": w(keys[3], (C, C)), "bp": jnp.zeros((1, C), jnp.float32),
        "ln2_g": jnp.ones((1, C), jnp.float32),
        "ln2_b": jnp.zeros((1, C), jnp.float32),
        "w1": w(keys[4], (C, H)), "b1": jnp.zeros((1, H), jnp.float32),
        "w2": w(keys[5], (H, C)), "b2": jnp.zeros((1, C), jnp.float32),
    }

    # Build the causal mask with key-state query rows allowed to attend everywhere.
    M = block_size + len_key_states
    mask_full = jnp.tril(jnp.ones((M, M), jnp.float32))
    mask_full = mask_full.at[:len_key_states, :].set(1.0)
    mask = mask_full[:T, :T]

    x = jax.random.normal(keys[6], (B, T, C), dtype=jnp.float32)

    out = block_forward(x, mask, params, n_head)
    out = jax.block_until_ready(out)

    ref = block_reference(x, mask, params, n_head)
    # Tolerance accounts for the approximate (EUP) softmax reciprocal and
    # fp-reordering from the fused/restructured contractions.
    assert jnp.allclose(out, ref, atol=1e-3, rtol=1e-3), "mismatch vs reference"

    print("KERNEL_OK")
</pallas_src>

<mosaic_0001>
module attributes {stable_mosaic.version = 11 : i64} {
  func.func @block_kernel(%arg0: i32, %arg1: memref<16x32xf32, #tpu.memory_space<vmem>>, %arg2: memref<16x16xf32, #tpu.memory_space<vmem>>, %arg3: memref<1x32xf32, #tpu.memory_space<vmem>>, %arg4: memref<1x32xf32, #tpu.memory_space<vmem>>, %arg5: memref<32x96xf32, #tpu.memory_space<vmem>>, %arg6: memref<1x96xf32, #tpu.memory_space<vmem>>, %arg7: memref<4x8x32xf32, #tpu.memory_space<vmem>>, %arg8: memref<1x32xf32, #tpu.memory_space<vmem>>, %arg9: memref<1x32xf32, #tpu.memory_space<vmem>>, %arg10: memref<1x32xf32, #tpu.memory_space<vmem>>, %arg11: memref<32x128xf32, #tpu.memory_space<vmem>>, %arg12: memref<1x128xf32, #tpu.memory_space<vmem>>, %arg13: memref<128x32xf32, #tpu.memory_space<vmem>>, %arg14: memref<1x32xf32, #tpu.memory_space<vmem>>, %arg15: memref<16x32xf32, #tpu.memory_space<vmem>>) attributes {dimension_semantics = [#tpu.dimension_semantics<parallel>], iteration_bounds = array<i64: 1>, scalar_prefetch = 0 : i64, scratch_operands = 0 : i64, tpu.core_type = #tpu.core_type<tc>, window_params = [{pipeline_mode = #tpu.pipeline_mode<synchronous>, transform_indices = @transform_0, window_bounds = array<i64: 16, 32>}, {pipeline_mode = #tpu.pipeline_mode<synchronous>, transform_indices = @transform_1, window_bounds = array<i64: 16, 16>}, {pipeline_mode = #tpu.pipeline_mode<synchronous>, transform_indices = @transform_2, window_bounds = array<i64: 1, 32>}, {pipeline_mode = #tpu.pipeline_mode<synchronous>, transform_indices = @transform_3, window_bounds = array<i64: 1, 32>}, {pipeline_mode = #tpu.pipeline_mode<synchronous>, transform_indices = @transform_4, window_bounds = array<i64: 32, 96>}, {pipeline_mode = #tpu.pipeline_mode<synchronous>, transform_indices = @transform_5, window_bounds = array<i64: 1, 96>}, {pipeline_mode = #tpu.pipeline_mode<synchronous>, transform_indices = @transform_6, window_bounds = array<i64: 4, 8, 32>}, {pipeline_mode = #tpu.pipeline_mode<synchronous>, transform_indices = @transform_7, window_bounds = array<i64: 1, 32>}, {pipeline_mode = #tpu.pipeline_mode<synchronous>, transform_indices = @transform_8, window_bounds = array<i64: 1, 32>}, {pipeline_mode = #tpu.pipeline_mode<synchronous>, transform_indices = @transform_9, window_bounds = array<i64: 1, 32>}, {pipeline_mode = #tpu.pipeline_mode<synchronous>, transform_indices = @transform_10, window_bounds = array<i64: 32, 128>}, {pipeline_mode = #tpu.pipeline_mode<synchronous>, transform_indices = @transform_11, window_bounds = array<i64: 1, 128>}, {pipeline_mode = #tpu.pipeline_mode<synchronous>, transform_indices = @transform_12, window_bounds = array<i64: 128, 32>}, {pipeline_mode = #tpu.pipeline_mode<synchronous>, transform_indices = @transform_13, window_bounds = array<i64: 1, 32>}, {pipeline_mode = #tpu.pipeline_mode<synchronous>, transform_indices = @transform_14, window_bounds = array<i64: 16, 32>}]} {
    %c0 = arith.constant 0 : index
    %c0_0 = arith.constant 0 : index
    %0 = vector.load %arg1[%c0, %c0_0] : memref<16x32xf32, #tpu.memory_space<vmem>>, vector<16x32xf32>
    %c0_1 = arith.constant 0 : index
    %c0_2 = arith.constant 0 : index
    %1 = vector.load %arg3[%c0_1, %c0_2] : memref<1x32xf32, #tpu.memory_space<vmem>>, vector<1x32xf32>
    %c0_3 = arith.constant 0 : index
    %c0_4 = arith.constant 0 : index
    %2 = vector.load %arg4[%c0_3, %c0_4] : memref<1x32xf32, #tpu.memory_space<vmem>>, vector<1x32xf32>
    %cst = arith.constant dense<0.000000e+00> : vector<16xf32>
    %3 = vector.multi_reduction <add>, %0, %cst [1] : vector<16x32xf32> to vector<16xf32>
    %4 = vector.shape_cast %3 : vector<16xf32> to vector<16x1xf32>
    %cst_5 = arith.constant 3.200000e+01 : f32
    %5 = vector.broadcast %cst_5 : f32 to vector<16x1xf32>
    %6 = arith.divf %4, %5 : vector<16x1xf32>
    %7 = vector.broadcast %6 : vector<16x1xf32> to vector<16x32xf32>
    %8 = arith.subf %0, %7 : vector<16x32xf32>
    %9 = arith.mulf %8, %8 : vector<16x32xf32>
    %cst_6 = arith.constant dense<0.000000e+00> : vector<16xf32>
    %10 = vector.multi_reduction <add>, %9, %cst_6 [1] : vector<16x32xf32> to vector<16xf32>
    %11 = vector.shape_cast %10 : vector<16xf32> to vector<16x1xf32>
    %cst_7 = arith.constant 3.200000e+01 : f32
    %12 = vector.broadcast %cst_7 : f32 to vector<16x1xf32>
    %13 = arith.divf %11, %12 : vector<16x1xf32>
    %14 = vector.broadcast %6 : vector<16x1xf32> to vector<16x32xf32>
    %15 = arith.subf %0, %14 : vector<16x32xf32>
    %cst_8 = arith.constant 9.99999974E-6 : f32
    %16 = vector.broadcast %cst_8 : f32 to vector<16x1xf32>
    %17 = arith.addf %13, %16 : vector<16x1xf32>
    %18 = math.rsqrt %17 : vector<16x1xf32>
    %19 = vector.broadcast %18 : vector<16x1xf32> to vector<16x32xf32>
    %20 = arith.mulf %15, %19 : vector<16x32xf32>
    %21 = vector.broadcast %1 : vector<1x32xf32> to vector<16x32xf32>
    %22 = arith.mulf %20, %21 : vector<16x32xf32>
    %23 = vector.broadcast %2 : vector<1x32xf32> to vector<16x32xf32>
    %24 = arith.addf %22, %23 : vector<16x32xf32>
    %c0_9 = arith.constant 0 : index
    %c0_10 = arith.constant 0 : index
    %25 = vector.load %arg5[%c0_9, %c0_10] : memref<32x96xf32, #tpu.memory_space<vmem>>, vector<32x96xf32>
    %cst_11 = arith.constant dense<0.000000e+00> : vector<16x96xf32>
    %26 = tpu.matmul %24, %25, %cst_11 {dimension_numbers = #tpu.dot_dimension_numbers<[1], [0], [0], [1], [0, 0, 1, 1], [], []>} : vector<16x32xf32>, vector<32x96xf32>, vector<16x96xf32> -> vector<16x96xf32>
    %c0_12 = arith.constant 0 : index
    %c0_13 = arith.constant 0 : index
    %27 = vector.load %arg6[%c0_12, %c0_13] : memref<1x96xf32, #tpu.memory_space<vmem>>, vector<1x96xf32>
    %28 = vector.broadcast %27 : vector<1x96xf32> to vector<16x96xf32>
    %29 = arith.addf %26, %28 : vector<16x96xf32>
    %30 = vector.extract_strided_slice %29 {offsets = [0, 0], sizes = [16, 32], strides = [1, 1]} : vector<16x96xf32> to vector<16x32xf32>
    %31 = vector.extract_strided_slice %29 {offsets = [0, 32], sizes = [16, 32], strides = [1, 1]} : vector<16x96xf32> to vector<16x32xf32>
    %32 = vector.extract_strided_slice %29 {offsets = [0, 64], sizes = [16, 32], strides = [1, 1]} : vector<16x96xf32> to vector<16x32xf32>
    %c0_14 = arith.constant 0 : index
    %c0_15 = arith.constant 0 : index
    %33 = vector.load %arg2[%c0_14, %c0_15] : memref<16x16xf32, #tpu.memory_space<vmem>>, vector<16x16xf32>
    %c0_16 = arith.constant 0 : index
    %c0_17 = arith.constant 0 : index
    %34 = vector.load %arg8[%c0_16, %c0_17] : memref<1x32xf32, #tpu.memory_space<vmem>>, vector<1x32xf32>
    %35 = vector.broadcast %34 : vector<1x32xf32> to vector<16x32xf32>
    %36 = arith.addf %0, %35 : vector<16x32xf32>
    %37 = vector.extract_strided_slice %30 {offsets = [0, 0], sizes = [16, 8], strides = [1, 1]} : vector<16x32xf32> to vector<16x8xf32>
    %38 = vector.extract_strided_slice %31 {offsets = [0, 0], sizes = [16, 8], strides = [1, 1]} : vector<16x32xf32> to vector<16x8xf32>
    %39 = vector.extract_strided_slice %32 {offsets = [0, 0], sizes = [16, 8], strides = [1, 1]} : vector<16x32xf32> to vector<16x8xf32>
    %cst_18 = arith.constant dense<0.000000e+00> : vector<16x16xf32>
    %40 = tpu.matmul %37, %38, %cst_18 {dimension_numbers = #tpu.dot_dimension_numbers<[1], [1], [0], [0], [0, 0, 1, 0], [], []>} : vector<16x8xf32>, vector<16x8xf32>, vector<16x16xf32> -> vector<16x16xf32>
    %41 = arith.addf %40, %33 : vector<16x16xf32>
    %cst_19 = arith.constant dense<0xFF800000> : vector<16xf32>
    %42 = vector.multi_reduction <maximumf>, %41, %cst_19 [1] : vector<16x16xf32> to vector<16xf32>
    %43 = vector.shape_cast %42 : vector<16xf32> to vector<16x1xf32>
    %44 = vector.broadcast %43 : vector<16x1xf32> to vector<16x16xf32>
    %45 = arith.subf %41, %44 : vector<16x16xf32>
    %46 = math.exp %45 : vector<16x16xf32>
    %cst_20 = arith.constant dense<0.000000e+00> : vector<16xf32>
    %47 = vector.multi_reduction <add>, %46, %cst_20 [1] : vector<16x16xf32> to vector<16xf32>
    %48 = vector.shape_cast %47 : vector<16xf32> to vector<16x1xf32>
    %49 = tpu.reciprocal %48 {approx = true} : vector<16x1xf32> -> vector<16x1xf32>
    %50 = vector.broadcast %49 : vector<16x1xf32> to vector<16x16xf32>
    %51 = arith.mulf %46, %50 : vector<16x16xf32>
    %cst_21 = arith.constant dense<0.000000e+00> : vector<16x8xf32>
    %52 = tpu.matmul %51, %39, %cst_21 {dimension_numbers = #tpu.dot_dimension_numbers<[1], [0], [0], [1], [0, 0, 1, 1], [], []>} : vector<16x16xf32>, vector<16x8xf32>, vector<16x8xf32> -> vector<16x8xf32>
    %c0_22 = arith.constant 0 : index
    %c0_23 = arith.constant 0 : index
    %c0_24 = arith.constant 0 : index
    %53 = vector.load %arg7[%c0_22, %c0_23, %c0_24] : memref<4x8x32xf32, #tpu.memory_space<vmem>>, vector<1x8x32xf32>
    %54 = vector.shape_cast %53 : vector<1x8x32xf32> to vector<8x32xf32>
    %cst_25 = arith.constant dense<0.000000e+00> : vector<16x32xf32>
    %55 = tpu.matmul %52, %54, %cst_25 {dimension_numbers = #tpu.dot_dimension_numbers<[1], [0], [0], [1], [0, 0, 1, 1], [], []>} : vector<16x8xf32>, vector<8x32xf32>, vector<16x32xf32> -> vector<16x32xf32>
    %56 = arith.addf %36, %55 : vector<16x32xf32>
    %57 = vector.extract_strided_slice %30 {offsets = [0, 8], sizes = [16, 8], strides = [1, 1]} : vector<16x32xf32> to vector<16x8xf32>
    %58 = vector.extract_strided_slice %31 {offsets = [0, 8], sizes = [16, 8], strides = [1, 1]} : vector<16x32xf32> to vector<16x8xf32>
    %59 = vector.extract_strided_slice %32 {offsets = [0, 8], sizes = [16, 8], strides = [1, 1]} : vector<16x32xf32> to vector<16x8xf32>
    %cst_26 = arith.constant dense<0.000000e+00> : vector<16x16xf32>
    %60 = tpu.matmul %57, %58, %cst_26 {dimension_numbers = #tpu.dot_dimension_numbers<[1], [1], [0], [0], [0, 0, 1, 0], [], []>} : vector<16x8xf32>, vector<16x8xf32>, vector<16x16xf32> -> vector<16x16xf32>
    %61 = arith.addf %60, %33 : vector<16x16xf32>
    %cst_27 = arith.constant dense<0xFF800000> : vector<16xf32>
    %62 = vector.multi_reduction <maximumf>, %61, %cst_27 [1] : vector<16x16xf32> to vector<16xf32>
    %63 = vector.shape_cast %62 : vector<16xf32> to vector<16x1xf32>
    %64 = vector.broadcast %63 : vector<16x1xf32> to vector<16x16xf32>
    %65 = arith.subf %61, %64 : vector<16x16xf32>
    %66 = math.exp %65 : vector<16x16xf32>
    %cst_28 = arith.constant dense<0.000000e+00> : vector<16xf32>
    %67 = vector.multi_reduction <add>, %66, %cst_28 [1] : vector<16x16xf32> to vector<16xf32>
    %68 = vector.shape_cast %67 : vector<16xf32> to vector<16x1xf32>
    %69 = tpu.reciprocal %68 {approx = true} : vector<16x1xf32> -> vector<16x1xf32>
    %70 = vector.broadcast %69 : vector<16x1xf32> to vector<16x16xf32>
    %71 = arith.mulf %66, %70 : vector<16x16xf32>
    %cst_29 = arith.constant dense<0.000000e+00> : vector<16x8xf32>
    %72 = tpu.matmul %71, %59, %cst_29 {dimension_numbers = #tpu.dot_dimension_numbers<[1], [0], [0], [1], [0, 0, 1, 1], [], []>} : vector<16x16xf32>, vector<16x8xf32>, vector<16x8xf32> -> vector<16x8xf32>
    %c1 = arith.constant 1 : index
    %c0_30 = arith.constant 0 : index
    %c0_31 = arith.constant 0 : index
    %73 = vector.load %arg7[%c1, %c0_30, %c0_31] : memref<4x8x32xf32, #tpu.memory_space<vmem>>, vector<1x8x32xf32>
    %74 = vector.shape_cast %73 : vector<1x8x32xf32> to vector<8x32xf32>
    %cst_32 = arith.constant dense<0.000000e+00> : vector<16x32xf32>
    %75 = tpu.matmul %72, %74, %cst_32 {dimension_numbers = #tpu.dot_dimension_numbers<[1], [0], [0], [1], [0, 0, 1, 1], [], []>} : vector<16x8xf32>, vector<8x32xf32>, vector<16x32xf32> -> vector<16x32xf32>
    %76 = arith.addf %56, %75 : vector<16x32xf32>
    %77 = vector.extract_strided_slice %30 {offsets = [0, 16], sizes = [16, 8], strides = [1, 1]} : vector<16x32xf32> to vector<16x8xf32>
    %78 = vector.extract_strided_slice %31 {offsets = [0, 16], sizes = [16, 8], strides = [1, 1]} : vector<16x32xf32> to vector<16x8xf32>
    %79 = vector.extract_strided_slice %32 {offsets = [0, 16], sizes = [16, 8], strides = [1, 1]} : vector<16x32xf32> to vector<16x8xf32>
    %cst_33 = arith.constant dense<0.000000e+00> : vector<16x16xf32>
    %80 = tpu.matmul %77, %78, %cst_33 {dimension_numbers = #tpu.dot_dimension_numbers<[1], [1], [0], [0], [0, 0, 1, 0], [], []>} : vector<16x8xf32>, vector<16x8xf32>, vector<16x16xf32> -> vector<16x16xf32>
    %81 = arith.addf %80, %33 : vector<16x16xf32>
    %cst_34 = arith.constant dense<0xFF800000> : vector<16xf32>
    %82 = vector.multi_reduction <maximumf>, %81, %cst_34 [1] : vector<16x16xf32> to vector<16xf32>
    %83 = vector.shape_cast %82 : vector<16xf32> to vector<16x1xf32>
    %84 = vector.broadcast %83 : vector<16x1xf32> to vector<16x16xf32>
    %85 = arith.subf %81, %84 : vector<16x16xf32>
    %86 = math.exp %85 : vector<16x16xf32>
    %cst_35 = arith.constant dense<0.000000e+00> : vector<16xf32>
    %87 = vector.multi_reduction <add>, %86, %cst_35 [1] : vector<16x16xf32> to vector<16xf32>
    %88 = vector.shape_cast %87 : vector<16xf32> to vector<16x1xf32>
    %89 = tpu.reciprocal %88 {approx = true} : vector<16x1xf32> -> vector<16x1xf32>
    %90 = vector.broadcast %89 : vector<16x1xf32> to vector<16x16xf32>
    %91 = arith.mulf %86, %90 : vector<16x16xf32>
    %cst_36 = arith.constant dense<0.000000e+00> : vector<16x8xf32>
    %92 = tpu.matmul %91, %79, %cst_36 {dimension_numbers = #tpu.dot_dimension_numbers<[1], [0], [0], [1], [0, 0, 1, 1], [], []>} : vector<16x16xf32>, vector<16x8xf32>, vector<16x8xf32> -> vector<16x8xf32>
    %c2 = arith.constant 2 : index
    %c0_37 = arith.constant 0 : index
    %c0_38 = arith.constant 0 : index
    %93 = vector.load %arg7[%c2, %c0_37, %c0_38] : memref<4x8x32xf32, #tpu.memory_space<vmem>>, vector<1x8x32xf32>
    %94 = vector.shape_cast %93 : vector<1x8x32xf32> to vector<8x32xf32>
    %cst_39 = arith.constant dense<0.000000e+00> : vector<16x32xf32>
    %95 = tpu.matmul %92, %94, %cst_39 {dimension_numbers = #tpu.dot_dimension_numbers<[1], [0], [0], [1], [0, 0, 1, 1], [], []>} : vector<16x8xf32>, vector<8x32xf32>, vector<16x32xf32> -> vector<16x32xf32>
    %96 = arith.addf %76, %95 : vector<16x32xf32>
    %97 = vector.extract_strided_slice %30 {offsets = [0, 24], sizes = [16, 8], strides = [1, 1]} : vector<16x32xf32> to vector<16x8xf32>
    %98 = vector.extract_strided_slice %31 {offsets = [0, 24], sizes = [16, 8], strides = [1, 1]} : vector<16x32xf32> to vector<16x8xf32>
    %99 = vector.extract_strided_slice %32 {offsets = [0, 24], sizes = [16, 8], strides = [1, 1]} : vector<16x32xf32> to vector<16x8xf32>
    %cst_40 = arith.constant dense<0.000000e+00> : vector<16x16xf32>
    %100 = tpu.matmul %97, %98, %cst_40 {dimension_numbers = #tpu.dot_dimension_numbers<[1], [1], [0], [0], [0, 0, 1, 0], [], []>} : vector<16x8xf32>, vector<16x8xf32>, vector<16x16xf32> -> vector<16x16xf32>
    %101 = arith.addf %100, %33 : vector<16x16xf32>
    %cst_41 = arith.constant dense<0xFF800000> : vector<16xf32>
    %102 = vector.multi_reduction <maximumf>, %101, %cst_41 [1] : vector<16x16xf32> to vector<16xf32>
    %103 = vector.shape_cast %102 : vector<16xf32> to vector<16x1xf32>
    %104 = vector.broadcast %103 : vector<16x1xf32> to vector<16x16xf32>
    %105 = arith.subf %101, %104 : vector<16x16xf32>
    %106 = math.exp %105 : vector<16x16xf32>
    %cst_42 = arith.constant dense<0.000000e+00> : vector<16xf32>
    %107 = vector.multi_reduction <add>, %106, %cst_42 [1] : vector<16x16xf32> to vector<16xf32>
    %108 = vector.shape_cast %107 : vector<16xf32> to vector<16x1xf32>
    %109 = tpu.reciprocal %108 {approx = true} : vector<16x1xf32> -> vector<16x1xf32>
    %110 = vector.broadcast %109 : vector<16x1xf32> to vector<16x16xf32>
    %111 = arith.mulf %106, %110 : vector<16x16xf32>
    %cst_43 = arith.constant dense<0.000000e+00> : vector<16x8xf32>
    %112 = tpu.matmul %111, %99, %cst_43 {dimension_numbers = #tpu.dot_dimension_numbers<[1], [0], [0], [1], [0, 0, 1, 1], [], []>} : vector<16x16xf32>, vector<16x8xf32>, vector<16x8xf32> -> vector<16x8xf32>
    %c3 = arith.constant 3 : index
    %c0_44 = arith.constant 0 : index
    %c0_45 = arith.constant 0 : index
    %113 = vector.load %arg7[%c3, %c0_44, %c0_45] : memref<4x8x32xf32, #tpu.memory_space<vmem>>, vector<1x8x32xf32>
    %114 = vector.shape_cast %113 : vector<1x8x32xf32> to vector<8x32xf32>
    %cst_46 = arith.constant dense<0.000000e+00> : vector<16x32xf32>
    %115 = tpu.matmul %112, %114, %cst_46 {dimension_numbers = #tpu.dot_dimension_numbers<[1], [0], [0], [1], [0, 0, 1, 1], [], []>} : vector<16x8xf32>, vector<8x32xf32>, vector<16x32xf32> -> vector<16x32xf32>
    %116 = arith.addf %96, %115 : vector<16x32xf32>
    %c0_47 = arith.constant 0 : index
    %c0_48 = arith.constant 0 : index
    %117 = vector.load %arg9[%c0_47, %c0_48] : memref<1x32xf32, #tpu.memory_space<vmem>>, vector<1x32xf32>
    %c0_49 = arith.constant 0 : index
    %c0_50 = arith.constant 0 : index
    %118 = vector.load %arg10[%c0_49, %c0_50] : memref<1x32xf32, #tpu.memory_space<vmem>>, vector<1x32xf32>
    %cst_51 = arith.constant dense<0.000000e+00> : vector<16xf32>
    %119 = vector.multi_reduction <add>, %116, %cst_51 [1] : vector<16x32xf32> to vector<16xf32>
    %120 = vector.shape_cast %119 : vector<16xf32> to vector<16x1xf32>
    %cst_52 = arith.constant 3.200000e+01 : f32
    %121 = vector.broadcast %cst_52 : f32 to vector<16x1xf32>
    %122 = arith.divf %120, %121 : vector<16x1xf32>
    %123 = vector.broadcast %122 : vector<16x1xf32> to vector<16x32xf32>
    %124 = arith.subf %116, %123 : vector<16x32xf32>
    %125 = arith.mulf %124, %124 : vector<16x32xf32>
    %cst_53 = arith.constant dense<0.000000e+00> : vector<16xf32>
    %126 = vector.multi_reduction <add>, %125, %cst_53 [1] : vector<16x32xf32> to vector<16xf32>
    %127 = vector.shape_cast %126 : vector<16xf32> to vector<16x1xf32>
    %cst_54 = arith.constant 3.200000e+01 : f32
    %128 = vector.broadcast %cst_54 : f32 to vector<16x1xf32>
    %129 = arith.divf %127, %128 : vector<16x1xf32>
    %130 = vector.broadcast %122 : vector<16x1xf32> to vector<16x32xf32>
    %131 = arith.subf %116, %130 : vector<16x32xf32>
    %cst_55 = arith.constant 9.99999974E-6 : f32
    %132 = vector.broadcast %cst_55 : f32 to vector<16x1xf32>
    %133 = arith.addf %129, %132 : vector<16x1xf32>
    %134 = math.rsqrt %133 : vector<16x1xf32>
    %135 = vector.broadcast %134 : vector<16x1xf32> to vector<16x32xf32>
    %136 = arith.mulf %131, %135 : vector<16x32xf32>
    %137 = vector.broadcast %117 : vector<1x32xf32> to vector<16x32xf32>
    %138 = arith.mulf %136, %137 : vector<16x32xf32>
    %139 = vector.broadcast %118 : vector<1x32xf32> to vector<16x32xf32>
    %140 = arith.addf %138, %139 : vector<16x32xf32>
    %c0_56 = arith.constant 0 : index
    %c0_57 = arith.constant 0 : index
    %141 = vector.load %arg11[%c0_56, %c0_57] : memref<32x128xf32, #tpu.memory_space<vmem>>, vector<32x128xf32>
    %cst_58 = arith.constant dense<0.000000e+00> : vector<16x128xf32>
    %142 = tpu.matmul %140, %141, %cst_58 {dimension_numbers = #tpu.dot_dimension_numbers<[1], [0], [0], [1], [0, 0, 1, 1], [], []>} : vector<16x32xf32>, vector<32x128xf32>, vector<16x128xf32> -> vector<16x128xf32>
    %c0_59 = arith.constant 0 : index
    %c0_60 = arith.constant 0 : index
    %143 = vector.load %arg12[%c0_59, %c0_60] : memref<1x128xf32, #tpu.memory_space<vmem>>, vector<1x128xf32>
    %144 = vector.broadcast %143 : vector<1x128xf32> to vector<16x128xf32>
    %145 = arith.addf %142, %144 : vector<16x128xf32>
    %cst_61 = arith.constant 5.000000e-01 : f32
    %146 = vector.broadcast %cst_61 : f32 to vector<16x128xf32>
    %147 = arith.mulf %146, %145 : vector<16x128xf32>
    %cst_62 = arith.constant 0.707106769 : f32
    %148 = vector.broadcast %cst_62 : f32 to vector<16x128xf32>
    %149 = arith.mulf %145, %148 : vector<16x128xf32>
    %150 = math.erf %149 : vector<16x128xf32>
    %cst_63 = arith.constant 1.000000e+00 : f32
    %151 = vector.broadcast %cst_63 : f32 to vector<16x128xf32>
    %152 = arith.addf %151, %150 : vector<16x128xf32>
    %153 = arith.mulf %147, %152 : vector<16x128xf32>
    %c0_64 = arith.constant 0 : index
    %c0_65 = arith.constant 0 : index
    %154 = vector.load %arg13[%c0_64, %c0_65] : memref<128x32xf32, #tpu.memory_space<vmem>>, vector<128x32xf32>
    %cst_66 = arith.constant dense<0.000000e+00> : vector<16x32xf32>
    %155 = tpu.matmul %153, %154, %cst_66 {dimension_numbers = #tpu.dot_dimension_numbers<[1], [0], [0], [1], [0, 0, 1, 1], [], []>} : vector<16x128xf32>, vector<128x32xf32>, vector<16x32xf32> -> vector<16x32xf32>
    %c0_67 = arith.constant 0 : index
    %c0_68 = arith.constant 0 : index
    %156 = vector.load %arg14[%c0_67, %c0_68] : memref<1x32xf32, #tpu.memory_space<vmem>>, vector<1x32xf32>
    %157 = vector.broadcast %156 : vector<1x32xf32> to vector<16x32xf32>
    %158 = arith.addf %155, %157 : vector<16x32xf32>
    %159 = arith.addf %116, %158 : vector<16x32xf32>
    %c0_69 = arith.constant 0 : index
    %c0_70 = arith.constant 0 : index
    %160 = vector.load %arg15[%c0_69, %c0_70] : memref<16x32xf32, #tpu.memory_space<vmem>>, vector<16x32xf32>
    tpu.vector_store %arg15[%c0_69, %c0_70], %159 {strides = array<i32>} : memref<16x32xf32, #tpu.memory_space<vmem>>, vector<16x32xf32>,
    return
  }
  func.func @transform_0(%arg0: i32) -> (i32, i32) {
    %c0_i32 = arith.constant 0 : i32
    %c0_i32_0 = arith.constant 0 : i32
    %c0_i32_1 = arith.constant 0 : i32
    return %c0_i32, %c0_i32_0 : i32, i32
  }
  func.func @transform_1(%arg0: i32) -> (i32, i32) {
    %c0_i32 = arith.constant 0 : i32
    %c0_i32_0 = arith.constant 0 : i32
    %c0_i32_1 = arith.constant 0 : i32
    return %c0_i32, %c0_i32_0 : i32, i32
  }
  func.func @transform_2(%arg0: i32) -> (i32, i32) {
    %c0_i32 = arith.constant 0 : i32
    %c0_i32_0 = arith.constant 0 : i32
    %c0_i32_1 = arith.constant 0 : i32
    return %c0_i32, %c0_i32_0 : i32, i32
  }
  func.func @transform_3(%arg0: i32) -> (i32, i32) {
    %c0_i32 = arith.constant 0 : i32
    %c0_i32_0 = arith.constant 0 : i32
    %c0_i32_1 = arith.constant 0 : i32
    return %c0_i32, %c0_i32_0 : i32, i32
  }
  func.func @transform_4(%arg0: i32) -> (i32, i32) {
    %c0_i32 = arith.constant 0 : i32
    %c0_i32_0 = arith.constant 0 : i32
    %c0_i32_1 = arith.constant 0 : i32
    return %c0_i32, %c0_i32_0 : i32, i32
  }
  func.func @transform_5(%arg0: i32) -> (i32, i32) {
    %c0_i32 = arith.constant 0 : i32
    %c0_i32_0 = arith.constant 0 : i32
    %c0_i32_1 = arith.constant 0 : i32
    return %c0_i32, %c0_i32_0 : i32, i32
  }
  func.func @transform_6(%arg0: i32) -> (i32, i32, i32) {
    %c0_i32 = arith.constant 0 : i32
    %c0_i32_0 = arith.constant 0 : i32
    %c0_i32_1 = arith.constant 0 : i32
    %c0_i32_2 = arith.constant 0 : i32
    return %c0_i32, %c0_i32_0, %c0_i32_1 : i32, i32, i32
  }
  func.func @transform_7(%arg0: i32) -> (i32, i32) {
    %c0_i32 = arith.constant 0 : i32
    %c0_i32_0 = arith.constant 0 : i32
    %c0_i32_1 = arith.constant 0 : i32
    return %c0_i32, %c0_i32_0 : i32, i32
  }
  func.func @transform_8(%arg0: i32) -> (i32, i32) {
    %c0_i32 = arith.constant 0 : i32
    %c0_i32_0 = arith.constant 0 : i32
    %c0_i32_1 = arith.constant 0 : i32
    return %c0_i32, %c0_i32_0 : i32, i32
  }
  func.func @transform_9(%arg0: i32) -> (i32, i32) {
    %c0_i32 = arith.constant 0 : i32
    %c0_i32_0 = arith.constant 0 : i32
    %c0_i32_1 = arith.constant 0 : i32
    return %c0_i32, %c0_i32_0 : i32, i32
  }
  func.func @transform_10(%arg0: i32) -> (i32, i32) {
    %c0_i32 = arith.constant 0 : i32
    %c0_i32_0 = arith.constant 0 : i32
    %c0_i32_1 = arith.constant 0 : i32
    return %c0_i32, %c0_i32_0 : i32, i32
  }
  func.func @transform_11(%arg0: i32) -> (i32, i32) {
    %c0_i32 = arith.constant 0 : i32
    %c0_i32_0 = arith.constant 0 : i32
    %c0_i32_1 = arith.constant 0 : i32
    return %c0_i32, %c0_i32_0 : i32, i32
  }
  func.func @transform_12(%arg0: i32) -> (i32, i32) {
    %c0_i32 = arith.constant 0 : i32
    %c0_i32_0 = arith.constant 0 : i32
    %c0_i32_1 = arith.constant 0 : i32
    return %c0_i32, %c0_i32_0 : i32, i32
  }
  func.func @transform_13(%arg0: i32) -> (i32, i32) {
    %c0_i32 = arith.constant 0 : i32
    %c0_i32_0 = arith.constant 0 : i32
    %c0_i32_1 = arith.constant 0 : i32
    return %c0_i32, %c0_i32_0 : i32, i32
  }
  func.func @transform_14(%arg0: i32) -> (i32, i32) {
    %c0_i32 = arith.constant 0 : i32
    %c0_i32_0 = arith.constant 0 : i32
    %c0_i32_1 = arith.constant 0 : i32
    return %c0_i32, %c0_i32_0 : i32, i32
  }
}

</mosaic_0001>

<bundles_post_ra>
// kernel: tpu_custom_call.1
= control target key start
LH: loop header
LB: loop body
LE: loop exit
PB: predicated region body
PF: predicated region fallthrough
CT: control target
= control target key end

     0   :  { %vm52_vm0 = vcmask 261120   ;;  %s2439_s0 = inlined_call_operand.vmem [shape: f32[16,32], index: 0, kind: input, shape index: {}]   ;;  %s2440_s1 = inlined_call_operand.vmem [shape: f32[16,16], index: 1, kind: input, shape index: {}]   ;;  %s2441_s2 = inlined_call_operand.vmem [shape: f32[1,32], index: 2, kind: input, shape index: {}]   ;;  %s2442_s3 = inlined_call_operand.vmem [shape: f32[1,32], index: 3, kind: input, shape index: {}]   ;;  %s2443_s4 = inlined_call_operand.vmem [shape: f32[32,96], index: 4, kind: input, shape index: {}]   ;;  %s2444_s5 = inlined_call_operand.vmem [shape: f32[1,96], index: 5, kind: input, shape index: {}]   ;;  %s2445_s6 = inlined_call_operand.vmem [shape: f32[4,8,32], index: 6, kind: input, shape index: {}]   ;;  %s2446_s7 = inlined_call_operand.vmem [shape: f32[1,32], index: 7, kind: input, shape index: {}]   ;;  %s2447_s8 = inlined_call_operand.vmem [shape: f32[1,32], index: 8, kind: input, shape index: {}]   ;;  %s2448_s9 = inlined_call_operand.vmem [shape: f32[1,32], index: 9, kind: input, shape index: {}]   ;;  %s2449_s10 = inlined_call_operand.vmem [shape: f32[32,128], index: 10, kind: input, shape index: {}]   ;;  %s2450_s11 = inlined_call_operand.vmem [shape: f32[1,128], index: 11, kind: input, shape index: {}]   ;;  %s2451_s12 = inlined_call_operand.vmem [shape: f32[128,32], index: 12, kind: input, shape index: {}]   ;;  %s2452_s13 = inlined_call_operand.vmem [shape: f32[1,32], index: 13, kind: input, shape index: {}]   ;;  %s2453_s14 = inlined_call_operand.hbm [shape: f32[16,32], index: 14, kind: output, shape index: {}]  }
   0x1   :  { %v2166_v0 = vld [vmem:[%s2439_s0] sm:$0xff]  ;;  %v2171_v1 = vld [vmem:[%s2439_s0 + $0x8] sm:$0xff] }
   0x2   :  { %19 = vsyncpa [#allocation3], 0  ;;  %v53_v2 = vsel %vm52_vm0, %v2166_v0, 0.0  ;;  %v56_v3 = vsel %vm52_vm0, %v2171_v1, 0.0  ;;  %v96_v14 = vld [vmem:[%s2443_s4] sm:$0xff]  ;;  %v97_v15 = vld [vmem:[%s2443_s4 + $0x8] sm:$0xff] }
   0x3   :  { %54 = vadd.xlane.f32.xlu0 %v53_v2  ;;  %v98_v16 = vld [vmem:[%s2443_s4 + $0x10] sm:$0xff]  ;;  %v1856_v17 = vpack.c.bf16 %v97_v15, %v96_v14  ;;  %v99_v18 = vld [vmem:[%s2443_s4 + $0x18] sm:$0xff]  ;;  %v1602_v27 = vld [vmem:[%s2441_s2] ss:$0 sm:$0xff]  ;;  %vm205_vm1 = vcmask 64512   ;;  %s2074_s2 = smov 96  }
   0x4   :  { %v1860_v19 = vpack.c.bf16 %v99_v18, %v98_v16  ;;  %v1603_v29 = vld [vmem:[%s2442_s3] ss:$0 sm:$0xff]  ;;  %s2075_s3 = smov 88   ;;  %s2077_s29 = smov 112   ;;  %vm2222_vm2 = vmpackc.low %vm205_vm1, %vm205_vm1  ;;  %v2240_v49 = vld [vmem:[%s2440_s1 + $0x8] sm:$0xff]  ;;  %vm289_vm3 = vcmask 130048  }
   0x5   :  { %1857 = vmatprep.subr.bf16.mxu0 %v1856_v17  ;;  %v1604_v36 = vld [vmem:[%s2444_s5] ss:$0 sm:$0xff]  ;;  %s2076_s5 = smov 120   ;;  %s2079_s17 = smov 80  }
   0x6   :  { %1859 = vmatpush3.bf16.msra.mxu0 %v1856_v17  ;;  %v2235_v47 = vld [vmem:[%s2440_s1] sm:$0xff]  ;;  %s2078_s1 = smov 64   ;;  %s2080_s20 = smov 72  }
   0x7   :  { %57 = vadd.xlane.f32.xlu0 %v56_v3  ;;  %1861 = vmatprep.subr.bf16.mxu0 %v1860_v19  ;;  %s2081_s21 = smov 104   ;;  %s2082_s22 = smov 56  }
   0x8   :  { %s2083_s25 = smov 48   ;;  %s2084_s4 = smov 40  }
   0x9   :  { %s2085_s26 = smov [#allocation2]  }
   0xa   :  { %1863 = vmatpush3.bf16.msra.mxu0 %v1860_v19  ;;  %s1591_s27 = sshll.u32 %s2085_s26, 4  ;;  %s1592_s27 = int_to_ptr.vmem [resolvable:$true] %s1591_s27 }
   0xb   :  { %s2050_s28 = scalar_lea.vmem %s1592_s27, 256  ;;  %p2055_p1 = scmp.lt.s32.totalorder %s1592_s27, %s1592_s27 }
   0xc   :  { %p2051_p0 = scmp.ne.s32.totalorder %s1592_s27, %s2050_s28  ;;  %p2056_p2 = scmp.lt.s32.totalorder %s2050_s28, %s2050_s28 }
   0xe   :  { %p2057_p3 = por %p2056_p2, %p2055_p1 }
  0x10   :  { %p2058_p4 = pnand %p2057_p3, %p2051_p0 }
  0x90   :  { %v55_v4 = vpop.xlane.xlu0 %54 }
  0x91   :  { %v60_v5 = vmul.f32 0.03125, %v55_v4 }
  0x93   :  { %v62_v6 = vsub.f32 %v2166_v0, %v60_v5 }
  0x94   :  { %v58_v7 = vpop.xlane.xlu0 %57 }
  0x95   :  { %v61_v8 = vmul.f32 0.03125, %v58_v7  ;;  %v64_v9 = vmul.f32 %v62_v6, %v62_v6 }
  0x97   :  { %v63_v10 = vsub.f32 %v2171_v1, %v61_v8  ;;  %v66_v11 = vsel %vm52_vm0, %v64_v9, 0.0 }
  0x98   :  { %67 = vadd.xlane.f32.xlu1 %v66_v11 }
  0x99   :  { %v65_v12 = vmul.f32 %v63_v10, %v63_v10 }
  0x9b   :  { %v69_v13 = vsel %vm52_vm0, %v65_v12, 0.0 }
  0x9c   :  { %70 = vadd.xlane.f32.xlu1 %v69_v13 }
 0x125   :  { %v68_v20 = vpop.xlane.xlu1 %67 }
 0x126   :  { %v72_v21 = vmul.f32 0.03125, %v68_v20 }
 0x128   :  { %v74_v22 = vadd.f32 1e-05, %v72_v21 }
 0x129   :  { %v71_v23 = vpop.xlane.xlu1 %70 }
 0x12a   :  { %2006 = vrsqrt.f32 %v74_v22  ;;  %v73_v24 = vmul.f32 0.03125, %v71_v23 }
 0x12c   :  { %v75_v25 = vadd.f32 1e-05, %v73_v24 }
 0x12e   :  { %2008 = vrsqrt.f32 %v75_v25 }
 0x134   :  { %v2007_v26 = vpop.eup %2006 }
 0x135   :  { %v78_v28 = vmul.f32 %v2007_v26, %v62_v6 }
 0x137   :  { %v86_v30 = vmul.f32 %v1602_v27, %v78_v28 }
 0x138   :  { %v2009_v31 = vpop.eup %2008 }
 0x139   :  { %v79_v32 = vmul.f32 %v2009_v31, %v63_v10  ;;  %v94_v33 = vadd.f32 %v1603_v29, %v86_v30  ;;  %v399_v10 = vld [vmem:[%s2445_s6] sm:$0xff] }
 0x13b   :  { %v87_v34 = vmul.f32 %v1602_v27, %v79_v32  ;;  %1731 = vmatprep.mubr.msk.f32.mxu0 %vm52_vm0, %v94_v33 }
 0x13d   :  { %v95_v35 = vadd.f32 %v1603_v29, %v87_v34 }
 0x13f   :  { %1732 = vmatmul.mubr.msk.f32.vlgmr.msra.gmra.mrb[0].mxu0 %vm52_vm0, %v95_v35 }
 0x212   :  { %v1733_v37 = vpop.f32.mrb[0].mxu0 }
 0x213   :  { %v2204_v38 = vadd.f32 %v1733_v37, %v1604_v36  ;;  %v179_v39 = vpop.f32.mrb[1].mxu0 }
 0x214   :  { %v2206_v40 = vadd.f32 %v1604_v36, %v179_v39 }
 0x216   :  { %1738 = vmatprep.mubr.msk.f32.mxu0 %vm205_vm1, %v2206_v40  ;;  %v2212_v41 = vpack.i.bf16 %v2204_v38, %v2206_v40 }
 0x218   :  { %1967 = vrot.lane.b32.xlu0 %v2212_v41, %s2074_s2 }
 0x21c   :  { %1977 = vrot.lane.b32.xlu0 %v2212_v41, %s2075_s3 }
 0x220   :  { %483 = vrot.lane.b32.xlu0 %v2206_v40, %s2076_s5 }
 0x224   :  { %485 = vrot.lane.b32.xlu0 %v2204_v38, %s2076_s5 }
 0x228   :  { %768 = vrot.lane.b32.xlu0 %v2206_v40, %s2077_s29 }
 0x28a   :  { %v1968_v42 = vpop.permute.xlu0 %1967 }
 0x28b   :  { %v1970_v43 = vunpack.i.h.bf16 %v1968_v42  ;;  %v1969_v44 = vunpack.i.l.bf16 %v1968_v42 }
 0x28d   :  { %v1864_v46 = vpack.c.bf16 %v1970_v43, %v1969_v44 }
 0x28e   :  { %v1978_v9 = vpop.permute.xlu0 %1977 }
 0x28f   :  { %1866 = vmatprep.subr.msk.bf16.mxu0 %vm2222_vm2, %v1864_v46  ;;  %v1980_v13 = vunpack.i.h.bf16 %v1978_v9  ;;  %v1979_v14 = vunpack.i.l.bf16 %v1978_v9 }
 0x290   :  { %1869 = vmatpush3.bf16.xpose.msk.msra.mxu0 %vm2222_vm2, %v1864_v46 }
 0x291   :  { %v1874_v17 = vpack.c.bf16 %v1980_v13, %v1979_v14 }
 0x292   :  { %v484_v19 = vpop.permute.xlu0 %483 }
 0x296   :  { %v486_v25 = vpop.permute.xlu0 %485 }
 0x297   :  { %1739 = vmatmul.mubr.msk.f32.vlgmr.msra.gmra.mrb[2].mxu0 %vm205_vm1, %v2204_v38 }
 0x29a   :  { %v769_v26 = vpop.permute.xlu0 %768 }
 0x36a   :  { %v1740_v48 = vpop.f32.mrb[2].mxu0 }
 0x36b   :  { %v280_v50 = vpop.f32.mrb[3].mxu0  ;;  %v286_v52 = vadd.f32 %v1740_v48, %v2240_v49 }
 0x36c   :  { %v281_v51 = vadd.f32 %v280_v50, %v2235_v47 }
 0x36d   :  { %v293_v54 = vsel %vm289_vm3, %v286_v52, -inf }
 0x36e   :  { %v290_v53 = vsel %vm289_vm3, %v281_v51, -inf }
 0x36f   :  { %291 = vmax.xlane.f32.xlu1 %v290_v53 }
 0x373   :  { %294 = vmax.xlane.f32.xlu1 %v293_v54 }
 0x3fc   :  { %v292_v55 = vpop.xlane.xlu1 %291 }
 0x3fd   :  { %v296_v56 = vsub.f32 %v281_v51, %v292_v55 }
 0x3ff   :  { %v298_v59 = vmul.f32 1.442695, %v296_v56 }
 0x400   :  { %v295_v57 = vpop.xlane.xlu1 %294 }
 0x401   :  { %v297_v58 = vsub.f32 %v286_v52, %v295_v57 }
 0x403   :  { %v300_v60 = vmul.f32 1.442695, %v297_v58 }
 0x405   :  { %2010 = vpow2.f32 %v300_v60 }
 0x406   :  { %2012 = vpow2.f32 %v298_v59 }
 0x40f   :  { %v2011_v61 = vpop.eup %2010 }
 0x410   :  { %v305_v62 = vsel %vm289_vm3, %v2011_v61, 0.0  ;;  %v2013_v63 = vpop.eup %2012 }
 0x411   :  { %306 = vadd.xlane.f32.xlu1 %v305_v62  ;;  %v302_v2 = vsel %vm289_vm3, %v2013_v63, 0.0 }
 0x415   :  { %303 = vadd.xlane.f32.xlu1 %v302_v2 }
 0x426   :  { %1972 = vrot.lane.b32.xlu1 %v2212_v41, %s2078_s1 }
 0x42a   :  { %1982 = vrot.lane.b32.xlu1 %v2212_v41, %s2079_s17 }
 0x42e   :  { %770 = vrot.lane.b32.xlu1 %v2204_v38, %s2077_s29 }
 0x49e   :  { %v307_v3 = vpop.xlane.xlu1 %306 }
 0x49f   :  { %2014 = vrcp.f32 %v307_v3 }
 0x4a2   :  { %v304_v4 = vpop.xlane.xlu1 %303 }
 0x4a3   :  { %2016 = vrcp.f32 %v304_v4 }
 0x4a6   :  { %v1973_v5 = vpop.permute.xlu1 %1972 }
 0x4a7   :  { %v1975_v6 = vunpack.i.h.bf16 %v1973_v5  ;;  %v1974_v7 = vunpack.i.l.bf16 %v1973_v5 }
 0x4a9   :  { %v1870_v8 = vpack.c.bf16 %v1975_v6, %v1974_v7  ;;  %v2015_v11 = vpop.eup %2014 }
 0x4aa   :  { %v311_v16 = vmul.f32 %v2015_v11, %v2011_v61  ;;  %v1983_v18 = vpop.permute.xlu1 %1982 }
 0x4ab   :  { %1871 = vmatprep.subr.bf16.mxu0 %v1870_v8  ;;  %v1985_v20 = vunpack.i.h.bf16 %v1983_v18  ;;  %v1984_v21 = vunpack.i.l.bf16 %v1983_v18 }
 0x4ac   :  { %1873 = vmatpush3.bf16.msra.mxu0 %v1870_v8 }
 0x4ad   :  { %v2017_v12 = vpop.eup %2016  ;;  %1748 = vmatprep.subr.mxu0 %v399_v10  ;;  %v1884_v24 = vpack.c.bf16 %v1985_v20, %v1984_v21 }
 0x4ae   :  { %v310_v15 = vmul.f32 %v2017_v12, %v2013_v63  ;;  %v771_v27 = vpop.permute.xlu1 %770 }
 0x4b0   :  { %1745 = vmatprep.mubr.msk.f32.mxu0 %vm289_vm3, %v310_v15 }
 0x4b1   :  { %1746 = vmatmul.mubr.msk.f32.vlgmr.msra.gmra.mrb[4].mxu0 %vm289_vm3, %v311_v16 }
 0x4b2   :  { %1749 = vmatpush3.msra.mxu0 %v399_v10 }
 0x4b3   :  { %1876 = vmatprep.subr.msk.bf16.mxu0 %vm2222_vm2, %v1874_v17 }
 0x584   :  { %v1747_v22 = vpop.f32.mrb[4].mxu0 }
 0x585   :  { %v390_v23 = vpop.f32.mrb[5].mxu0 }
 0x586   :  { %1750 = vmatprep.mubr.msk.f32.mxu0 %vm205_vm1, %v390_v23 }
 0x587   :  { %1751 = vmatmul.mubr.msk.f32.vlgmr.msra.gmra.mrb[6].mxu0 %vm205_vm1, %v1747_v22 }
 0x588   :  { %1879 = vmatpush3.bf16.xpose.msk.msra.mxu0 %vm2222_vm2, %v1874_v17  ;;  %1757 = vmatprep.mubr.msk.f32.mxu0 %vm205_vm1, %v484_v19 }
 0x589   :  { %1886 = vmatprep.subr.msk.bf16.mxu0 %vm2222_vm2, %v1884_v24 }
 0x58f   :  { %1758 = vmatmul.mubr.msk.f32.vlgmr.msra.gmra.mrb[8].mxu0 %vm205_vm1, %v486_v25  ;;  %v1622_v25 = vld [vmem:[%s2445_s6 + $0x8] sm:$0xff] }
 0x590   :  { %1889 = vmatpush3.bf16.xpose.msk.msra.mxu0 %vm2222_vm2, %v1884_v24  ;;  %1776 = vmatprep.mubr.msk.f32.mxu0 %vm205_vm1, %v769_v26 }
 0x597   :  { %1777 = vmatmul.mubr.msk.f32.vlgmr.msra.gmra.mrb[10].mxu0 %vm205_vm1, %v771_v27 }
 0x65a   :  { %v2271_v28 = vpop.f32.mrb[6].mxu0 }
 0x65b   :  { %v2273_v29 = vpop.f32.mrb[7].mxu0 }
 0x662   :  { %v1759_v30 = vpop.f32.mrb[8].mxu0 }
 0x663   :  { %v571_v31 = vadd.f32 %v1759_v30, %v2240_v49  ;;  %v565_v32 = vpop.f32.mrb[9].mxu0 }
 0x664   :  { %v566_v33 = vadd.f32 %v565_v32, %v2235_v47 }
 0x665   :  { %v577_v34 = vsel %vm289_vm3, %v571_v31, -inf }
 0x666   :  { %578 = vmax.xlane.f32.xlu1 %v577_v34  ;;  %v574_v35 = vsel %vm289_vm3, %v566_v33, -inf }
 0x667   :  { %575 = vmax.xlane.f32.xlu0 %v574_v35 }
 0x66a   :  { %v1778_v36 = vpop.f32.mrb[10].mxu0 }
 0x66b   :  { %v850_v37 = vpop.f32.mrb[11].mxu0  ;;  %v856_v39 = vadd.f32 %v1778_v36, %v2240_v49 }
 0x66c   :  { %v851_v45 = vadd.f32 %v850_v37, %v2235_v47 }
 0x66d   :  { %v862_v42 = vsel %vm289_vm3, %v856_v39, -inf }
 0x66e   :  { %v859_v63 = vsel %vm289_vm3, %v851_v45, -inf }
 0x677   :  { %1992 = vrot.lane.b32.xlu1 %v2212_v41, %s2080_s20 }
 0x67b   :  { %1053 = vrot.lane.b32.xlu1 %v2206_v40, %s2081_s21 }
 0x67f   :  { %1055 = vrot.lane.b32.xlu1 %v2204_v38, %s2081_s21 }
 0x6a3   :  { %863 = vmax.xlane.f32.xlu1 %v862_v42 }
 0x6f3   :  { %v579_v43 = vpop.xlane.xlu1 %578 }
 0x6f4   :  { %v581_v44 = vsub.f32 %v571_v31, %v579_v43  ;;  %v576_v46 = vpop.xlane.xlu0 %575 }
 0x6f5   :  { %v580_v48 = vsub.f32 %v566_v33, %v576_v46 }
 0x6f6   :  { %v584_v50 = vmul.f32 1.442695, %v581_v44 }
 0x6f7   :  { %v582_v51 = vmul.f32 1.442695, %v580_v48  ;;  %v1993_v52 = vpop.permute.xlu1 %1992 }
 0x6f8   :  { %2018 = vpow2.f32 %v584_v50  ;;  %v1995_v53 = vunpack.i.h.bf16 %v1993_v52  ;;  %v1994_v54 = vunpack.i.l.bf16 %v1993_v52 }
 0x6f9   :  { %2020 = vpow2.f32 %v582_v51 }
 0x6fa   :  { %v1894_v55 = vpack.c.bf16 %v1995_v53, %v1994_v54  ;;  %v1631_v54 = vld [vmem:[%s2445_s6 + $0x10] sm:$0xff] }
 0x6fb   :  { %v1054_v40 = vpop.permute.xlu1 %1053 }
 0x6fc   :  { %1896 = vmatprep.subr.msk.bf16.mxu0 %vm2222_vm2, %v1894_v55  ;;  %1795 = vmatprep.mubr.msk.f32.mxu0 %vm205_vm1, %v1054_v40 }
 0x6fd   :  { %1899 = vmatpush3.bf16.xpose.msk.msra.mxu0 %vm2222_vm2, %v1894_v55 }
 0x6ff   :  { %v1056_v56 = vpop.permute.xlu1 %1055 }
 0x702   :  { %v2019_v38 = vpop.eup %2018 }
 0x703   :  { %v589_v57 = vsel %vm289_vm3, %v2019_v38, 0.0  ;;  %v2021_v58 = vpop.eup %2020 }
 0x704   :  { %1796 = vmatmul.mubr.msk.f32.vlgmr.msra.gmra.mrb[12].mxu0 %vm205_vm1, %v1056_v56  ;;  %590 = vadd.xlane.f32.xlu0 %v589_v57  ;;  %v586_v59 = vsel %vm289_vm3, %v2021_v58, 0.0 }
 0x708   :  { %587 = vadd.xlane.f32.xlu0 %v586_v59 }
 0x71e   :  { %1987 = vrot.lane.b32.xlu0 %v2212_v41, %s2082_s22 }
 0x730   :  { %v864_v60 = vpop.xlane.xlu1 %863 }
 0x731   :  { %v866_v61 = vsub.f32 %v856_v39, %v864_v60 }
 0x733   :  { %v869_v62 = vmul.f32 1.442695, %v866_v61 }
 0x735   :  { %2022 = vpow2.f32 %v869_v62 }
 0x73d   :  { %860 = vmax.xlane.f32.xlu0 %v859_v63 }
 0x73f   :  { %v2295_v2 = vpop.eup %2022 }
 0x740   :  { %v874_v3 = vsel %vm289_vm3, %v2295_v2, 0.0 }
 0x741   :  { %875 = vadd.xlane.f32.xlu0 %v874_v3 }
 0x791   :  { %v591_v4 = vpop.xlane.xlu0 %590 }
 0x792   :  { %2024 = vrcp.f32 %v591_v4  ;;  %v1607_v4 = vld [vmem:[%s2446_s7] ss:$0 sm:$0xff] }
 0x795   :  { %v588_v5 = vpop.xlane.xlu0 %587 }
 0x796   :  { %2026 = vrcp.f32 %v588_v5  ;;  %v198_v5 = vadd.f32 %v1607_v4, %v2171_v1 }
 0x799   :  { %v1988_v6 = vpop.permute.xlu0 %1987 }
 0x79a   :  { %v1990_v7 = vunpack.i.h.bf16 %v1988_v6  ;;  %v1989_v8 = vunpack.i.l.bf16 %v1988_v6  ;;  %v197_v6 = vadd.f32 %v1607_v4, %v2166_v0  ;;  %v1498_v4 = vld [vmem:[%s2451_s12 + $0x70] sm:$0xff] }
 0x79c   :  { %v1880_v9 = vpack.c.bf16 %v1990_v7, %v1989_v8  ;;  %v2025_v10 = vpop.eup %2024  ;;  %v482_v7 = vadd.f32 %v2271_v28, %v198_v5  ;;  %v481_v8 = vadd.f32 %v2273_v29, %v197_v6  ;;  %v1499_v5 = vld [vmem:[%s2451_s12 + $0x78] sm:$0xff] }
 0x79d   :  { %v595_v13 = vmul.f32 %v2025_v10, %v2019_v38  ;;  %v1940_v6 = vpack.c.bf16 %v1499_v5, %v1498_v4 }
 0x79e   :  { %1881 = vmatprep.subr.bf16.mxu1 %v1880_v9 }
 0x79f   :  { %1883 = vmatpush3.bf16.msra.mxu1 %v1880_v9 }
 0x7a0   :  { %v2027_v11 = vpop.eup %2026  ;;  %1767 = vmatprep.subr.mxu1 %v1622_v25 }
 0x7a1   :  { %v594_v12 = vmul.f32 %v2027_v11, %v2021_v58 }
 0x7a3   :  { %1764 = vmatprep.mubr.msk.f32.mxu1 %vm289_vm3, %v594_v12 }
 0x7a4   :  { %1765 = vmatmul.mubr.msk.f32.vlgmr.msra.gmra.mrb[0].mxu1 %vm289_vm3, %v595_v13 }
 0x7a5   :  { %1768 = vmatpush3.msra.mxu1 %v1622_v25  ;;  %v1385_v25 = vld [vmem:[%s2449_s10 + $0x18] sm:$0xff] }
 0x7ca   :  { %v861_v14 = vpop.xlane.xlu0 %860 }
 0x7cb   :  { %v865_v15 = vsub.f32 %v851_v45, %v861_v14  ;;  %v1640_v45 = vld [vmem:[%s2445_s6 + $0x18] sm:$0xff] }
 0x7cd   :  { %v867_v16 = vmul.f32 1.442695, %v865_v15 }
 0x7cf   :  { %2028 = vpow2.f32 %v867_v16 }
 0x7d7   :  { %v1797_v17 = vpop.f32.mrb[12].mxu0 }
 0x7d8   :  { %v1135_v18 = vpop.f32.mrb[13].mxu0  ;;  %v1141_v22 = vadd.f32 %v1797_v17, %v2240_v49 }
 0x7d9   :  { %v2029_v19 = vpop.eup %2028  ;;  %v1136_v20 = vadd.f32 %v1135_v18, %v2235_v47  ;;  %v876_v47 = vpop.xlane.xlu0 %875 }
 0x7da   :  { %v871_v21 = vsel %vm289_vm3, %v2029_v19, 0.0  ;;  %v1147_v24 = vsel %vm289_vm3, %v1141_v22, -inf }
 0x7db   :  { %872 = vadd.xlane.f32.xlu0 %v871_v21  ;;  %v1144_v23 = vsel %vm289_vm3, %v1136_v20, -inf  ;;  %v1382_v21 = vld [vmem:[%s2449_s10] sm:$0xff] }
 0x7dc   :  { %1145 = vmax.xlane.f32.xlu1 %v1144_v23 }
 0x7e0   :  { %1148 = vmax.xlane.f32.xlu1 %v1147_v24  ;;  %v1384_v24 = vld [vmem:[%s2449_s10 + $0x10] sm:$0xff] }
 0x7f1   :  { %1997 = vrot.lane.b32.xlu0 %v2212_v41, %s2083_s25 }
 0x868   :  { %v873_v26 = vpop.xlane.xlu0 %872 }
 0x869   :  { %v1146_v27 = vpop.xlane.xlu1 %1145  ;;  %2030 = vrcp.f32 %v873_v26  ;;  %v1484_v26 = vld [vmem:[%s2451_s12] sm:$0xff] }
 0x86a   :  { %v1150_v49 = vsub.f32 %v1136_v20, %v1146_v27  ;;  %2032 = vrcp.f32 %v876_v47  ;;  %v1908_v47 = vpack.c.bf16 %v1385_v25, %v1384_v24  ;;  %v1485_v27 = vld [vmem:[%s2451_s12 + $0x8] sm:$0xff] }
 0x86c   :  { %v1998_v30 = vpop.permute.xlu0 %1997  ;;  %v1152_v36 = vmul.f32 1.442695, %v1150_v49  ;;  %v1486_v49 = vld [vmem:[%s2451_s12 + $0x10] sm:$0xff] }
 0x86d   :  { %v2000_v31 = vunpack.i.h.bf16 %v1998_v30  ;;  %v1999_v32 = vunpack.i.l.bf16 %v1998_v30  ;;  %v1149_v33 = vpop.xlane.xlu1 %1148  ;;  %v1912_v30 = vpack.c.bf16 %v1485_v27, %v1484_v26 }
 0x86e   :  { %v1151_v34 = vsub.f32 %v1141_v22, %v1149_v33  ;;  %v1383_v22 = vld [vmem:[%s2449_s10 + $0x8] sm:$0xff]  ;;  %v1488_v33 = vld [vmem:[%s2451_s12 + $0x20] sm:$0xff] }
 0x86f   :  { %v1890_v35 = vpack.c.bf16 %v2000_v31, %v1999_v32  ;;  %v1904_v23 = vpack.c.bf16 %v1383_v22, %v1382_v21  ;;  %v1487_v31 = vld [vmem:[%s2451_s12 + $0x18] sm:$0xff] }
 0x870   :  { %v1154_v37 = vmul.f32 1.442695, %v1151_v34  ;;  %v1916_v32 = vpack.c.bf16 %v1487_v31, %v1486_v49  ;;  %v1489_v34 = vld [vmem:[%s2451_s12 + $0x28] sm:$0xff] }
 0x871   :  { %1891 = vmatprep.subr.bf16.mxu1 %v1890_v35  ;;  %1905 = vmatprep.subr.bf16.mxu0 %v1904_v23 }
 0x872   :  { %2034 = vpow2.f32 %v1154_v37  ;;  %1907 = vmatpush3.bf16.msra.mxu0 %v1904_v23 }
 0x873   :  { %2036 = vpow2.f32 %v1152_v36  ;;  %v2031_v39 = vpop.eup %2030  ;;  %1909 = vmatprep.subr.bf16.mxu0 %v1908_v47 }
 0x874   :  { %v2033_v44 = vpop.eup %2032  ;;  %v879_v46 = vmul.f32 %v2031_v39, %v2029_v19 }
 0x875   :  { %v880_v50 = vmul.f32 %v2033_v44, %v2295_v2 }
 0x876   :  { %1911 = vmatpush3.bf16.msra.mxu0 %v1908_v47 }
 0x877   :  { %v1766_v42 = vpop.f32.mrb[0].mxu1 }
 0x878   :  { %v674_v43 = vpop.f32.mrb[1].mxu1 }
 0x879   :  { %1769 = vmatprep.mubr.msk.f32.mxu1 %vm205_vm1, %v674_v43 }
 0x87a   :  { %1770 = vmatmul.mubr.msk.f32.vlgmr.msra.gmra.mrb[2].mxu1 %vm205_vm1, %v1766_v42 }
 0x87b   :  { %1893 = vmatpush3.bf16.msra.mxu1 %v1890_v35  ;;  %1783 = vmatprep.mubr.msk.f32.mxu1 %vm289_vm3, %v879_v46  ;;  %v1920_v35 = vpack.c.bf16 %v1489_v34, %v1488_v33 }
 0x87c   :  { %v2035_v48 = vpop.eup %2034  ;;  %1786 = vmatprep.subr.mxu1 %v1631_v54 }
 0x87d   :  { %v1159_v51 = vsel %vm289_vm3, %v2035_v48, 0.0  ;;  %v2037_v52 = vpop.eup %2036 }
 0x87e   :  { %1160 = vadd.xlane.f32.xlu1 %v1159_v51  ;;  %1784 = vmatmul.mubr.msk.f32.vlgmr.msra.gmra.mrb[4].mxu1 %vm289_vm3, %v880_v50  ;;  %v1156_v53 = vsel %vm289_vm3, %v2037_v52, 0.0  ;;  %v1644_v51 = vld [vmem:[%s2448_s9] ss:$0 sm:$0xff] }
 0x87f   :  { %1787 = vmatpush3.msra.mxu1 %v1631_v54 }
 0x882   :  { %1157 = vadd.xlane.f32.xlu1 %v1156_v53 }
 0x893   :  { %2002 = vrot.lane.b32.xlu1 %v2212_v41, %s2084_s4 }
 0x90b   :  { %v1161_v55 = vpop.xlane.xlu1 %1160 }
 0x90f   :  { %v1158_v40 = vpop.xlane.xlu1 %1157 }
 0x910   :  { %2038 = vrcp.f32 %v1158_v40 }
 0x911   :  { %2040 = vrcp.f32 %v1161_v55 }
 0x913   :  { %v2003_v38 = vpop.permute.xlu1 %2002 }
 0x914   :  { %v2005_v56 = vunpack.i.h.bf16 %v2003_v38  ;;  %v2004_v57 = vunpack.i.l.bf16 %v2003_v38 }
 0x916   :  { %v1900_v58 = vpack.c.bf16 %v2005_v56, %v2004_v57  ;;  %v1490_v56 = vld [vmem:[%s2451_s12 + $0x30] sm:$0xff]  ;;  %v1491_v57 = vld [vmem:[%s2451_s12 + $0x38] sm:$0xff] }
 0x918   :  { %1901 = vmatprep.subr.bf16.mxu1 %v1900_v58 }
 0x91a   :  { %v2039_v59 = vpop.eup %2038 }
 0x91b   :  { %v2041_v62 = vpop.eup %2040  ;;  %v1164_v41 = vmul.f32 %v2039_v59, %v2037_v52  ;;  %v1492_v59 = vld [vmem:[%s2451_s12 + $0x40] sm:$0xff] }
 0x91c   :  { %v1165_v63 = vmul.f32 %v2041_v62, %v2035_v48  ;;  %v1643_v48 = vld [vmem:[%s2447_s8] ss:$0 sm:$0xff]  ;;  %v1494_v62 = vld [vmem:[%s2451_s12 + $0x50] sm:$0xff] }
 0x951   :  { %v1785_v60 = vpop.f32.mrb[4].mxu1 }
 0x952   :  { %v959_v61 = vpop.f32.mrb[5].mxu1 }
 0x953   :  { %1788 = vmatprep.mubr.msk.f32.mxu1 %vm205_vm1, %v959_v61 }
 0x954   :  { %1789 = vmatmul.mubr.msk.f32.vlgmr.msra.gmra.mrb[2].mxu1 %vm205_vm1, %v1785_v60  ;;  %v1493_v60 = vld [vmem:[%s2451_s12 + $0x48] sm:$0xff] }
 0x955   :  { %1903 = vmatpush3.bf16.msra.mxu1 %v1900_v58  ;;  %1802 = vmatprep.mubr.msk.f32.mxu1 %vm289_vm3, %v1164_v41  ;;  %v1924_v58 = vpack.c.bf16 %v1491_v57, %v1490_v56  ;;  %v1928_v61 = vpack.c.bf16 %v1493_v60, %v1492_v59  ;;  %v1495_v41 = vld [vmem:[%s2451_s12 + $0x58] sm:$0xff] }
 0x956   :  { %1805 = vmatprep.subr.mxu1 %v1640_v45 }
 0x958   :  { %1803 = vmatmul.mubr.msk.f32.vlgmr.msra.gmra.mrb[6].mxu1 %vm289_vm3, %v1165_v63  ;;  %v1496_v63 = vld [vmem:[%s2451_s12 + $0x60] sm:$0xff] }
 0x959   :  { %1806 = vmatpush3.msra.mxu1 %v1640_v45  ;;  %v1932_v45 = vpack.c.bf16 %v1495_v41, %v1494_v62 }
 0x95a   :  { %1913 = vmatprep.subr.bf16.mxu1 %v1912_v30 }
 0xa2b   :  { %v1804_v2 = vpop.f32.mrb[6].mxu1 }
 0xa2c   :  { %v1244_v3 = vpop.f32.mrb[7].mxu1 }
 0xa2d   :  { %1807 = vmatprep.mubr.msk.f32.mxu1 %vm205_vm1, %v1244_v3 }
 0xa2e   :  { %1808 = vmatmul.mubr.msk.f32.vlgmr.msra.gmra.mrb[2].mxu1 %vm205_vm1, %v1804_v2  ;;  %v1497_v2 = vld [vmem:[%s2451_s12 + $0x68] sm:$0xff] }
 0xa2f   :  { %1915 = vmatpush3.bf16.msra.mxu1 %v1912_v30  ;;  %v1936_v3 = vpack.c.bf16 %v1497_v2, %v1496_v63 }
 0xa30   :  { %1917 = vmatprep.subr.bf16.mxu1 %v1916_v32 }
 0xa33   :  { %1919 = vmatpush3.bf16.msra.mxu1 %v1916_v32 }
 0xa34   :  { %1921 = vmatprep.subr.bf16.mxu1 %v1920_v35 }
 0xa37   :  { %1923 = vmatpush3.bf16.msra.mxu1 %v1920_v35 }
 0xa38   :  { %1925 = vmatprep.subr.bf16.mxu1 %v1924_v58 }
 0xa3b   :  { %1927 = vmatpush3.bf16.msra.mxu1 %v1924_v58 }
 0xa3c   :  { %1929 = vmatprep.subr.bf16.mxu1 %v1928_v61 }
 0xa3f   :  { %1931 = vmatpush3.bf16.msra.mxu1 %v1928_v61 }
 0xa40   :  { %1933 = vmatprep.subr.bf16.mxu1 %v1932_v45 }
 0xa43   :  { %1935 = vmatpush3.bf16.msra.mxu1 %v1932_v45 }
 0xa44   :  { %1937 = vmatprep.subr.bf16.mxu1 %v1936_v3 }
 0xa47   :  { %1939 = vmatpush3.bf16.msra.mxu1 %v1936_v3 }
 0xa48   :  { %1941 = vmatprep.subr.bf16.mxu1 %v1940_v6 }
 0xa4b   :  { %1943 = vmatpush3.bf16.msra.mxu1 %v1940_v6 }
 0xb01   :  { %v1809_v9 = vpop.f32.mrb[2].mxu1 }
 0xb02   :  { %v2337_v10 = vadd.f32 %v1809_v9, %v482_v7  ;;  %v1327_v11 = vpop.f32.mrb[3].mxu1  ;;  %v1645_v7 = vld [vmem:[%s2450_s11] ss:$0 sm:$0xff] }
 0xb03   :  { %v2339_v12 = vadd.f32 %v1327_v11, %v481_v8 }
 0xb04   :  { %v1343_v13 = vsel %vm52_vm0, %v2337_v10, 0.0 }
 0xb05   :  { %1344 = vadd.xlane.f32.xlu1 %v1343_v13  ;;  %v1340_v14 = vsel %vm52_vm0, %v2339_v12, 0.0 }
 0xb06   :  { %1341 = vadd.xlane.f32.xlu0 %v1340_v14 }
 0xb92   :  { %v1345_v1 = vpop.xlane.xlu1 %1344 }
 0xb93   :  { %v1347_v0 = vmul.f32 0.03125, %v1345_v1  ;;  %v1342_v15 = vpop.xlane.xlu0 %1341 }
 0xb94   :  { %v1346_v28 = vmul.f32 0.03125, %v1342_v15 }
 0xb95   :  { %v1349_v29 = vsub.f32 %v2337_v10, %v1347_v0 }
 0xb96   :  { %v1348_v16 = vsub.f32 %v2339_v12, %v1346_v28 }
 0xb97   :  { %v1351_v19 = vmul.f32 %v1349_v29, %v1349_v29 }
 0xb98   :  { %v1350_v17 = vmul.f32 %v1348_v16, %v1348_v16 }
 0xb99   :  { %v1355_v20 = vsel %vm52_vm0, %v1351_v19, 0.0 }
 0xb9a   :  { %v1352_v18 = vsel %vm52_vm0, %v1350_v17, 0.0 }
 0xb9b   :  { %1353 = vadd.xlane.f32.xlu0 %v1352_v18 }
 0xb9f   :  { %1356 = vadd.xlane.f32.xlu0 %v1355_v20  ;;  %v1648_v20 = vld [vmem:[%s2452_s13] ss:$0 sm:$0xff] }
 0xc28   :  { %v1354_v36 = vpop.xlane.xlu0 %1353 }
 0xc29   :  { %v1358_v37 = vmul.f32 0.03125, %v1354_v36 }
 0xc2b   :  { %v1360_v39 = vadd.f32 1e-05, %v1358_v37 }
 0xc2c   :  { %v1357_v42 = vpop.xlane.xlu0 %1356 }
 0xc2d   :  { %2042 = vrsqrt.f32 %v1360_v39  ;;  %v1359_v43 = vmul.f32 0.03125, %v1357_v42 }
 0xc2f   :  { %v1361_v44 = vadd.f32 1e-05, %v1359_v43 }
 0xc31   :  { %2044 = vrsqrt.f32 %v1361_v44 }
 0xc37   :  { %v2043_v46 = vpop.eup %2042 }
 0xc38   :  { %v1364_v50 = vmul.f32 %v2043_v46, %v1348_v16 }
 0xc3a   :  { %v1372_v52 = vmul.f32 %v1643_v48, %v1364_v50 }
 0xc3b   :  { %v2045_v53 = vpop.eup %2044 }
 0xc3c   :  { %v1365_v54 = vmul.f32 %v2045_v53, %v1349_v29  ;;  %v1380_v55 = vadd.f32 %v1644_v51, %v1372_v52 }
 0xc3e   :  { %v1373_v40 = vmul.f32 %v1643_v48, %v1365_v54  ;;  %1818 = vmatprep.mubr.msk.f32.mxu0 %vm52_vm0, %v1380_v55 }
 0xc40   :  { %v1381_v38 = vadd.f32 %v1644_v51, %v1373_v40 }
 0xc42   :  { %1819 = vmatmul.mubr.msk.f32.vlgmr.msra.gmra.mrb[14].mxu0 %vm52_vm0, %v1381_v38 }
 0xd15   :  { %v1820_v8 = vpop.f32.mrb[14].mxu0 }
 0xd16   :  { %v1471_v9 = vadd.f32 %v1820_v8, %v1645_v7  ;;  %v1465_v11 = vpop.f32.mrb[15].mxu0 }
 0xd17   :  { %v1466_v13 = vadd.f32 %v1645_v7, %v1465_v11 }
 0xd18   :  { %v1477_v14 = vmul.f32 0.70710677, %v1471_v9  ;;  %v1475_v17 = vmul.f32 0.5, %v1471_v9 }
 0xd19   :  { %v1476_v1 = vmul.f32 0.70710677, %v1466_v13  ;;  %v1474_v29 = vmul.f32 0.5, %v1466_v13 }
 0xd1a   :  { %2046 = verf.f32 %v1477_v14 }
 0xd1b   :  { %2048 = verf.f32 %v1476_v1 }
 0xd24   :  { %v2047_v0 = vpop.eup %2046 }
 0xd25   :  { %v2049_v15 = vpop.eup %2048  ;;  %v1481_v28 = vadd.f32 1.0, %v2047_v0 }
 0xd26   :  { %v1480_v16 = vadd.f32 1.0, %v2049_v15 }
 0xd27   :  { %v1483_v19 = vmul.f32 %v1481_v28, %v1475_v17 }
 0xd28   :  { %v1482_v18 = vmul.f32 %v1480_v16, %v1474_v29 }
 0xd2a   :  { %1853 = vmatprep.mubr.f32.mxu1 %v1482_v18 }
 0xd2b   :  { %1854 = vmatmul.mubr.f32.vlgmr.msra.gmra.mrb[8].mxu1 %v1483_v19 }
 0xdfe   :  { %v1855_v21 = vpop.f32.mrb[8].mxu1 }
 0xdff   :  { %v1579_v22 = vadd.f32 %v1855_v21, %v1648_v20  ;;  %v1573_v23 = vpop.f32.mrb[9].mxu1 }
 0xe00   :  { %v1574_v24 = vadd.f32 %v1648_v20, %v1573_v23 }
 0xe01   :  { %v1583_v25 = vadd.f32 %v2337_v10, %v1579_v22 }
 0xe02   :  { %v1582_v47 = vadd.f32 %v2339_v12, %v1574_v24 }
 0xe03   :  { %1585 = vst.msk [vmem:[#allocation2 + $0x8] sm:$0xff] %vm52_vm0, %v1583_v25 }
 0xe04   :  { %1584 = vst.msk [vmem:[#allocation2] sm:$0xff] %vm52_vm0, %v1582_v47 }
 0xe05   :  { %2061 = shalt.err (!%p2058_p4)
}
 0xe06   :  { %s2062_s3 = scalar_lea.hbm %s2453_s14, 256 }
 0xe07   :  { %p2063_p5 = scmp.ne.s32.totalorder %s2453_s14, %s2062_s3  ;;  %p2066_p6 = scmp.lt.u32.totalorder %s2062_s3, %s2453_s14 }
 0xe09   :  { %p2068_p7 = pnand %p2066_p6, %p2063_p5 }
 0xe0b   :  { %2071 = shalt.err (!%p2068_p7)
}
 0xe0c   :  { %s2086_s9 = smov 128   ;;  %s2087_s29 = smov 8  }
 0xe0d   :  { %1597 = dma.vmem_to_hbm [thread:$0]  %s1592_s27, 256, %s2453_s14, [#allocation3], %s2086_s9, %s2086_s9, %s2087_s29  }
 0xe0e   :  { %2072 = dma.done.wait [#allocation3], 256  }
 0xe0f   :  { %2073 = vsyncadd [#allocation3], 4294967040 }
 0xe10   :  { %1601 = vsyncpa [#allocation3], 1 }

</bundles_post_ra>
